<compile_context>
chip_gen: v5e
topology: v5e:2x2
jax: 0.10.0
libtpu: 0.0.40
codegen_flags: <defaults>
</compile_context>

<pallas_src>
import functools

import jax
import jax.numpy as jnp
from jax import lax
from jax.experimental import pallas as pl
from jax.experimental.pallas import tpu as pltpu


def _round_up(n, m):
    return ((n + m - 1) // m) * m


# --------------------------------------------------------------------------
# Stage 1:  W = gallery_encode^T @ gallery_label        ([D, C_pad], f32)
# Grid: reduction over Ng tiles; output block is resident (accumulator).
# --------------------------------------------------------------------------
def _glw_kernel(g_ref, lab_ref, w_ref, *, ng, tn):
    k = pl.program_id(0)

    @pl.when(k == 0)
    def _():
        w_ref[...] = jnp.zeros_like(w_ref)

    g = g_ref[...]        # [tn, D]
    lab = lab_ref[...]    # [tn, C_pad]

    if ng % tn != 0:
        # Ragged last gallery tile: zero out rows past Ng so they contribute 0.
        row = lax.broadcasted_iota(jnp.int32, lab.shape, 0) + k * tn
        lab = jnp.where(row < ng, lab, jnp.zeros_like(lab))

    # W += g_tile^T @ lab_tile : contract the Ng axis (dim 0 of both operands)
    # directly via dot_general -- no explicit transpose in the kernel.
    w_ref[...] += lax.dot_general(
        g, lab,
        dimension_numbers=(((0,), (0,)), ((), ())),
        preferred_element_type=jnp.float32,
    )


# --------------------------------------------------------------------------
# Stage 2:  preds = softmax(query_encode @ W, axis=-1)
# Grid: "parallel" over Nq tiles; W resident in VMEM.
# --------------------------------------------------------------------------
def _att_softmax_kernel(q_ref, w_ref, out_ref, *, c_valid, c_pad):
    q = q_ref[...]        # [tm, D]
    w = w_ref[...]        # [D, C_pad] (f32)

    # att = q @ W  on the MXU, f32 accumulation.
    att = jnp.dot(q, w, preferred_element_type=jnp.float32)   # [tm, C_pad]

    if c_pad != c_valid:
        # Padded class columns must not participate in the softmax.
        col = lax.broadcasted_iota(jnp.int32, att.shape, 1)
        att = jnp.where(col < c_valid, att, jnp.float32(-1e30))

    # Row softmax (matches legacy nn.Softmax() dim=1 for 2-D input).
    m = jnp.max(att, axis=-1, keepdims=True)
    e = jnp.exp(att - m)
    denom = jnp.sum(e, axis=-1, keepdims=True)
    # approx=True -> EUP vrcp (free slot), ~1e-3 rel error, fine for probs.
    out_ref[...] = (e * pl.reciprocal(denom, approx=True)).astype(out_ref.dtype)


def classify(query_encode, gallery_encode, gallery_label,
             *, q_tile=256, g_tile=512, vmem_limit_bytes=None):
    """Pallas version of Classify.forward(query_encode, gallery_encode, gallery_label)."""
    nq, d = query_encode.shape
    ng, d2 = gallery_encode.shape
    assert d == d2
    ng2, c = gallery_label.shape
    assert ng == ng2

    # Lane-dense class dimension (multiple of 128); sliced back at the end.
    c_pad = max(128, _round_up(c, 128))
    lab = gallery_label if c_pad == c else jnp.pad(
        gallery_label, ((0, 0), (0, c_pad - c)))

    # Resident blocks after reassociation are tiny ([D, C_pad]); the scoped
    # VMEM default is enough, so vmem_limit_bytes is left as an optional knob
    # (raise it only if you enlarge q_tile/g_tile for production shapes).
    compiler_params_red = pltpu.CompilerParams(
        dimension_semantics=("arbitrary",),
        vmem_limit_bytes=vmem_limit_bytes,
    )
    compiler_params_par = pltpu.CompilerParams(
        dimension_semantics=("parallel",),
        vmem_limit_bytes=vmem_limit_bytes,
    )

    # ---- Stage 1: W = g^T @ lab ------------------------------------------
    tn = ng if ng <= g_tile else g_tile               # multiple of 8 when tiled
    w = pl.pallas_call(
        functools.partial(_glw_kernel, ng=ng, tn=tn),
        out_shape=jax.ShapeDtypeStruct((d, c_pad), jnp.float32),
        grid=(pl.cdiv(ng, tn),),
        in_specs=[
            pl.BlockSpec((tn, d), lambda k: (k, 0)),
            pl.BlockSpec((tn, c_pad), lambda k: (k, 0)),
        ],
        out_specs=pl.BlockSpec((d, c_pad), lambda k: (0, 0)),
        compiler_params=compiler_params_red,
    )(gallery_encode, lab)

    # ---- Stage 2: preds = softmax(q @ W) ---------------------------------
    tm = nq if nq <= q_tile else q_tile               # multiple of 8 when tiled
    preds_pad = pl.pallas_call(
        functools.partial(_att_softmax_kernel, c_valid=c, c_pad=c_pad),
        out_shape=jax.ShapeDtypeStruct((nq, c_pad), jnp.float32),
        grid=(pl.cdiv(nq, tm),),
        in_specs=[
            pl.BlockSpec((tm, d), lambda i: (i, 0)),
            pl.BlockSpec((d, c_pad), lambda i: (0, 0)),   # W resident in VMEM
        ],
        out_specs=pl.BlockSpec((tm, c_pad), lambda i: (i, 0)),
        compiler_params=compiler_params_par,
    )(query_encode, w)

    return preds_pad[:, :c] if c_pad != c else preds_pad


def classify_ref(query_encode, gallery_encode, gallery_label):
    inner = query_encode @ gallery_encode.T
    att = inner @ gallery_label
    return jax.nn.softmax(att, axis=-1)


if __name__ == "__main__":
    key = jax.random.PRNGKey(0)
    k1, k2, k3 = jax.random.split(key, 3)

    # Small shapes consistent with the forward pass.
    Nq, Ng, D, C = 8, 16, 32, 8

    query_encode = jax.random.normal(k1, (Nq, D), dtype=jnp.float32)
    gallery_encode = jax.random.normal(k2, (Ng, D), dtype=jnp.float32)
    label_ids = jax.random.randint(k3, (Ng,), 0, C)
    gallery_label = jax.nn.one_hot(label_ids, C, dtype=jnp.float32)   # one-hot [Ng, C]

    preds = classify(query_encode, gallery_encode, gallery_label)
    preds = jax.block_until_ready(preds)

    ref = classify_ref(query_encode, gallery_encode, gallery_label)
    assert preds.shape == (Nq, C)
    # Tolerance covers the matmul reassociation + EUP approx reciprocal.
    assert jnp.allclose(preds, ref, atol=2e-3, rtol=2e-3), float(
        jnp.max(jnp.abs(preds - ref)))

    print("KERNEL_OK")
</pallas_src>

<mosaic_0001>
module attributes {stable_mosaic.version = 11 : i64} {
  func.func @_glw_kernel(%arg0: i32, %arg1: memref<16x32xf32, #tpu.memory_space<vmem>>, %arg2: memref<16x128xf32, #tpu.memory_space<vmem>>, %arg3: memref<32x128xf32, #tpu.memory_space<vmem>>) attributes {dimension_semantics = [#tpu.dimension_semantics<arbitrary>], iteration_bounds = array<i64: 1>, scalar_prefetch = 0 : i64, scratch_operands = 0 : i64, tpu.core_type = #tpu.core_type<tc>, window_params = [{transform_indices = @transform_0, window_bounds = array<i64: 16, 32>}, {transform_indices = @transform_1, window_bounds = array<i64: 16, 128>}, {pipeline_mode = #tpu.pipeline_mode<synchronous>, transform_indices = @transform_2, window_bounds = array<i64: 32, 128>}]} {
    %c0_i32 = arith.constant 0 : i32
    %0 = arith.cmpi eq, %arg0, %c0_i32 : i32
    %1 = arith.extui %0 : i1 to i32
    %c0_i32_0 = arith.constant 0 : i32
    %2 = arith.cmpi ne, %1, %c0_i32_0 : i32
    scf.if %2 {
      %cst_8 = arith.constant 0.000000e+00 : f32
      %9 = vector.broadcast %cst_8 : f32 to vector<32x128xf32>
      %c0_9 = arith.constant 0 : index
      %c0_10 = arith.constant 0 : index
      %10 = vector.load %arg3[%c0_9, %c0_10] : memref<32x128xf32, #tpu.memory_space<vmem>>, vector<32x128xf32>
      tpu.vector_store %arg3[%c0_9, %c0_10], %9 {strides = array<i32>} : memref<32x128xf32, #tpu.memory_space<vmem>>, vector<32x128xf32>,
    } else {
    }
    %c0 = arith.constant 0 : index
    %c0_1 = arith.constant 0 : index
    %3 = vector.load %arg1[%c0, %c0_1] : memref<16x32xf32, #tpu.memory_space<vmem>>, vector<16x32xf32>
    %c0_2 = arith.constant 0 : index
    %c0_3 = arith.constant 0 : index
    %4 = vector.load %arg2[%c0_2, %c0_3] : memref<16x128xf32, #tpu.memory_space<vmem>>, vector<16x128xf32>
    %c0_4 = arith.constant 0 : index
    %c0_5 = arith.constant 0 : index
    %5 = vector.load %arg3[%c0_4, %c0_5] : memref<32x128xf32, #tpu.memory_space<vmem>>, vector<32x128xf32>
    %cst = arith.constant dense<0.000000e+00> : vector<32x128xf32>
    %6 = tpu.matmul %3, %4, %cst {dimension_numbers = #tpu.dot_dimension_numbers<[0], [0], [1], [1], [0, 1, 1, 1], [], []>} : vector<16x32xf32>, vector<16x128xf32>, vector<32x128xf32> -> vector<32x128xf32>
    %7 = arith.addf %5, %6 : vector<32x128xf32>
    %c0_6 = arith.constant 0 : index
    %c0_7 = arith.constant 0 : index
    %8 = vector.load %arg3[%c0_6, %c0_7] : memref<32x128xf32, #tpu.memory_space<vmem>>, vector<32x128xf32>
    tpu.vector_store %arg3[%c0_6, %c0_7], %7 {strides = array<i32>} : memref<32x128xf32, #tpu.memory_space<vmem>>, vector<32x128xf32>,
    return
  }
  func.func @transform_0(%arg0: i32) -> (i32, i32) {
    %c0_i32 = arith.constant 0 : i32
    %c0_i32_0 = arith.constant 0 : i32
    return %arg0, %c0_i32 : i32, i32
  }
  func.func @transform_1(%arg0: i32) -> (i32, i32) {
    %c0_i32 = arith.constant 0 : i32
    %c0_i32_0 = arith.constant 0 : i32
    return %arg0, %c0_i32 : i32, i32
  }
  func.func @transform_2(%arg0: i32) -> (i32, i32) {
    %c0_i32 = arith.constant 0 : i32
    %c0_i32_0 = arith.constant 0 : i32
    %c0_i32_1 = arith.constant 0 : i32
    return %c0_i32, %c0_i32_0 : i32, i32
  }
}

</mosaic_0001>

<bundles_post_ra>
// kernel: tpu_custom_call.1
= control target key start
LH: loop header
LB: loop body
LE: loop exit
PB: predicated region body
PF: predicated region fallthrough
CT: control target
= control target key end

     0   :  { %7 = vsyncpa [#allocation3], 0  ;;  %s294_s0 = inlined_call_operand.hbm [shape: f32[16,32], index: 0, kind: input, shape index: {}]   ;;  %s295_s1 = inlined_call_operand.hbm [shape: f32[16,128], index: 1, kind: input, shape index: {}]   ;;  %s296_s2 = inlined_call_operand.hbm [shape: f32[32,128], index: 2, kind: output, shape index: {}]  }
   0x1   :  { %8 = vsyncpa [#allocation6], 0 }
   0x2   :  { %9 = vsyncpa [#allocation4], 0  ;;  %s14_s11 = sshll.u32 %s294_s0, 4  ;;  %s256_s12 = smov [#allocation2]   ;;  %s15_s11 = int_to_ptr.hbm [resolvable:$true] %s14_s11 }
   0x3   :  { %s16_s13 = sshll.u32 %s256_s12, 4  ;;  %s27_s16 = sshll.u32 %s295_s1, 4  ;;  %s17_s13 = int_to_ptr.vmem [resolvable:$true] %s16_s13  ;;  %s28_s16 = int_to_ptr.hbm [resolvable:$true] %s27_s16 }
   0x4   :  { %s257_s17 = smov 128   ;;  %s258_s18 = smov 8  }
   0x5   :  { %22 = dma.hbm_to_vmem [thread:$0]  %s15_s11, 256, %s17_s13, [#allocation3], %s257_s17, %s257_s17, %s258_s18  }
   0x6   :  { %s259_s19 = smov [#allocation5]  }
   0x7   :  { %s29_s20 = sshll.u32 %s259_s19, 4  ;;  %s30_s20 = int_to_ptr.vmem [resolvable:$true] %s29_s20 }
   0x8   :  { %35 = dma.hbm_to_vmem [thread:$0]  %s28_s16, 256, %s30_s20, [#allocation6], %s257_s17, %s257_s17, %s258_s18  }
   0x9   :  { %250 = dma.done.wait [#allocation3], 256  }
   0xa   :  { %251 = vsyncadd [#allocation3], 4294967040 }
   0xb   :  { %252 = dma.done.wait [#allocation6], 256  }
   0xc   :  { %253 = vsyncadd [#allocation6], 4294967040  ;;  %v52_v0 = vld [vmem:[#allocation2] sm:$0xff]  ;;  %v55_v1 = vld [vmem:[#allocation5 + $0x8] sm:$0xff]  ;;  %vm92_vm0 = vcmask 130048   ;;  %s260_s0 = smov [#allocation7]  }
   0xd   :  { %60 = vxpose.xlu0.b32.start [1/2] (short) (narrow) %v52_v0, 32  ;;  %119 = vmatpush.msra.mxu0 %v55_v1  ;;  %v54_v2 = vld [vmem:[#allocation5] sm:$0xff]  ;;  %v53_v3 = vld [vmem:[#allocation2 + $0x8] sm:$0xff]  ;;  %s146_s1 = sshll.u32 %s260_s0, 4  ;;  %s148_s23 = sshll.u32 %s296_s2, 4  ;;  %s147_s1 = int_to_ptr.vmem [resolvable:$true] %s146_s1  ;;  %s149_s23 = int_to_ptr.hbm [resolvable:$true] %s148_s23 }
   0xe   :  { %166 = vmatpush.msra.mxu1 %v55_v1  ;;  %167 = vmatpush.msra.mxu2 %v55_v1 }
   0xf   :  { %120 = vmatpush.msra.mxu0 %v54_v2  ;;  %168 = vmatpush.msra.mxu3 %v55_v1 }
  0x10   :  { %169 = vmatpush.msra.mxu1 %v54_v2  ;;  %170 = vmatpush.msra.mxu2 %v54_v2 }
  0x11   :  { %171 = vmatpush.msra.mxu3 %v54_v2 }
  0x15   :  { %61 = vxpose.xlu0.b32.end [2/2] (short) (narrow) %v53_v3, 32 }
  0xb1   :  { %v76_v4 = vpop.trf.xlu0 }
  0xb2   :  { %162 = vmatmul.msk.f32.vlgmr.msra.gmra.mxu0 %vm92_vm0, %v76_v4 }
  0xb9   :  { %v77_v5 = vpop.trf.xlu0 }
  0xba   :  { %163 = vmatmul.msk.f32.vlgmr.msra.gmra.mxu1 %vm92_vm0, %v77_v5 }
  0xc1   :  { %v78_v6 = vpop.trf.xlu0 }
  0xc2   :  { %164 = vmatmul.msk.f32.vlgmr.msra.gmra.mxu2 %vm92_vm0, %v78_v6 }
  0xc9   :  { %v79_v7 = vpop.trf.xlu0 }
  0xca   :  { %165 = vmatmul.msk.f32.vlgmr.msra.gmra.mxu3 %vm92_vm0, %v79_v7 }
 0x12f   :  { %v122_v8 = vpop.f32.mrf.mxu0 }
 0x130   :  { %138 = vst [vmem:[#allocation7] sm:$0xff] %v122_v8 }
 0x137   :  { %v125_v9 = vpop.f32.mrf.mxu1 }
 0x138   :  { %139 = vst [vmem:[#allocation7 + $0x8] sm:$0xff] %v125_v9 }
 0x145   :  { %v128_v10 = vpop.f32.mrf.mxu2 }
 0x146   :  { %140 = vst [vmem:[#allocation7 + $0x10] sm:$0xff] %v128_v10 }
 0x14d   :  { %v131_v11 = vpop.f32.mrf.mxu3 }
 0x14e   :  { %141 = vst [vmem:[#allocation7 + $0x18] sm:$0xff] %v131_v11 }
 0x14f   :  { %154 = dma.vmem_to_hbm [thread:$0]  %s147_s1, 512, %s149_s23, [#allocation4], %s257_s17, %s257_s17, %s258_s18  }
 0x150   :  { %254 = dma.done.wait [#allocation4], 512  }
 0x151   :  { %255 = vsyncadd [#allocation4], 4294966784 }
 0x152   :  { %159 = vsyncpa [#allocation3], 1 }
 0x153   :  { %160 = vsyncpa [#allocation6], 1 }
 0x154   :  { %161 = vsyncpa [#allocation4], 1 }

</bundles_post_ra>
